<compile_context>
chip_gen: v6e
topology: v6e:2x2x1
jax: 0.10.0
libtpu: 0.0.40
codegen_flags: <defaults>
</compile_context>

<pallas_src>
import functools
import math

import jax
import jax.numpy as jnp
import numpy as np
from jax.experimental import pallas as pl
from jax.experimental.pallas import tpu as pltpu


def _round_up(x, m):
    return ((x + m - 1) // m) * m


def _cdiv(a, b):
    return -(-a // b)


def _pick_strip(tile_m):
    for s in (32, 16, 8):
        if tile_m % s == 0:
            return s
    return 8


def _loss_ls_kernel(pred_ref, tgt_ref, mask_ref, out_ref, *,
                    tile_v, strip, n_rows, n_cols, off, conf):
    """One (row-tile, vocab-tile) grid step.

    pred_ref : (TM, TV)  log-prob block, native dtype (upcast per 128-lane chunk)
    tgt_ref  : (TM, 1)   int32 target index per row
    mask_ref : (TM, 1)   float32 mask per row
    out_ref  : (8, 128)  lane-dense per-row-tile partial of
                         sum_i m_i * sum_j w_ij * pred_ij   (accumulated over k)
    """
    i = pl.program_id(0)
    k = pl.program_id(1)
    tm = pred_ref.shape[0]
    n_strips = tm // strip

    nk = _cdiv(n_cols, tile_v)              # static: number of vocab tiles
    rem = n_cols - (nk - 1) * tile_v        # static: cols in the last vocab tile
    row_tail = (n_rows % tm) != 0           # static: last row tile is partial

    off_f = jnp.float32(off)
    conf_f = jnp.float32(conf)

    @pl.when(k == 0)
    def _():
        out_ref[...] = jnp.zeros_like(out_ref)

    base = k * tile_v                       # first vocab column of this tile
    lane = jax.lax.broadcasted_iota(jnp.int32, (strip, 128), 1)

    def process(n_full, partial_cols):
        """Accumulate sum_j w*pred for this tile (n_full full 128-lane chunks
        plus an optional partial chunk with `partial_cols` valid lanes), fold
        into the (8,128) output block.  n_full/partial_cols are Python ints."""

        @pl.loop(0, n_strips)
        def _(r):
            row0 = pl.multiple_of(r * strip, strip)
            rows = pl.ds(row0, strip)
            # rel[s, l] == g*128  <=>  row s's target sits at lane l of chunk g
            rel = tgt_ref[rows, :] - base - lane            # (strip,128) int32
            acc = jnp.zeros((strip, 128), jnp.float32)
            for g in range(n_full):                          # static unroll
                chunk = pred_ref[rows, g * 128:(g + 1) * 128].astype(jnp.float32)
                w = jnp.where(rel == g * 128, conf_f, off_f)
                acc = acc + w * chunk
            if partial_cols:                                 # ragged vocab tail
                g = n_full
                chunk = pred_ref[rows, g * 128:(g + 1) * 128].astype(jnp.float32)
                w = jnp.where(rel == g * 128, conf_f, off_f)
                acc = acc + jnp.where(lane < partial_cols, w * chunk, 0.0)
            val = mask_ref[rows, :] * acc                    # (strip,128)
            if row_tail:                                     # ragged row tail
                rid = row0 + jax.lax.broadcasted_iota(jnp.int32, (strip, 128), 0)
                val = jnp.where(rid < n_rows - i * tm, val, 0.0)
            # Fold rows 8-at-a-time (pure vreg adds); lanes stay dense.
            out_ref[...] += val.reshape(strip // 8, 8, 128).sum(axis=0)

    if n_cols % tile_v == 0:
        process(tile_v // 128, 0)
    elif nk == 1:
        process(rem // 128, rem % 128)
    else:
        @pl.when(k == nk - 1)
        def _():
            process(rem // 128, rem % 128)

        @pl.when(k != nk - 1)
        def _():
            process(tile_v // 128, 0)


def loss_with_ls(prediction, target, mask, *, size, smooth,
                 tile_m=128, tile_v=8192):
    """prediction: (B, T, V) log-probs; target, mask: (B, T). Returns scalar loss."""
    B, T, V = prediction.shape
    assert V == size
    N = B * T

    pred2d = prediction.reshape(N, V)                 # native dtype, no HBM copy
    tgt2d = target.reshape(N, 1).astype(jnp.int32)
    mask2d = mask.reshape(N, 1).astype(jnp.float32)

    confidence = 1.0 - smooth
    off = smooth / (size - 1)
    c_const = 0.0                                     # 0*log(0) -> 0 (torch conv.)
    if confidence > 0.0:
        c_const += confidence * math.log(confidence)
    if off > 0.0:
        c_const += (size - 1) * off * math.log(off)

    # Shrink tiles for small problems (block dims must be multiples of (8,128)).
    tile_m = min(tile_m, _round_up(N, 8))
    tile_v = min(tile_v, _round_up(V, 128))
    # Give v7x's two TensorCores at least two row tiles to split ("parallel").
    if N > 8 and _cdiv(N, tile_m) < 2:
        tile_m = max(8, _round_up((N + 1) // 2, 8))
    strip = _pick_strip(tile_m)

    n_row_tiles = _cdiv(N, tile_m)
    n_col_tiles = _cdiv(V, tile_v)
    grid = (n_row_tiles, n_col_tiles)

    kernel = functools.partial(
        _loss_ls_kernel, tile_v=tile_v, strip=strip, n_rows=N, n_cols=V,
        off=float(off), conf=float(confidence))

    cost = pl.CostEstimate(
        flops=5 * N * V, transcendentals=0,
        bytes_accessed=N * V * pred2d.dtype.itemsize + 8 * N
                       + n_row_tiles * 8 * 128 * 4)

    partial_sums = pl.pallas_call(
        kernel,
        out_shape=jax.ShapeDtypeStruct((n_row_tiles * 8, 128), jnp.float32),
        grid_spec=pltpu.PrefetchScalarGridSpec(
            num_scalar_prefetch=0,
            grid=grid,
            in_specs=[
                pl.BlockSpec((tile_m, tile_v), lambda i, k: (i, k)),
                pl.BlockSpec((tile_m, 1), lambda i, k: (i, 0)),
                pl.BlockSpec((tile_m, 1), lambda i, k: (i, 0)),
            ],
            out_specs=pl.BlockSpec((8, 128), lambda i, k: (i, 0)),
        ),
        compiler_params=pltpu.CompilerParams(
            dimension_semantics=("parallel", "arbitrary")),
        cost_estimate=cost,
    )(pred2d, tgt2d, mask2d)

    # Tiny glue: loss = C - (sum of kernel partials) / mask.sum()
    return c_const - jnp.sum(partial_sums) / jnp.sum(mask2d)


def _reference(prediction, target, mask, *, size, smooth):
    """Pure-JAX reference matching the PyTorch module."""
    B, T, V = prediction.shape
    N = B * T
    pred = prediction.reshape(N, V).astype(jnp.float32)
    tgt = target.reshape(N).astype(jnp.int32)
    msk = mask.reshape(N).astype(jnp.float32)
    confidence = 1.0 - smooth
    off = smooth / (size - 1)
    labels = jnp.full((N, V), off, jnp.float32)
    labels = labels.at[jnp.arange(N), tgt].set(confidence)
    kl = jnp.where(labels > 0,
                   labels * (jnp.log(jnp.where(labels > 0, labels, 1.0)) - pred),
                   0.0)
    return (kl.sum(1) * msk).sum() / msk.sum()


def _run_case(key, B, T, V, smooth, dtype=jnp.float32, **tile_kwargs):
    k1, k2, k3 = jax.random.split(key, 3)
    logits = jax.random.normal(k1, (B, T, V), dtype=jnp.float32)
    prediction = jax.nn.log_softmax(logits, axis=-1).astype(dtype)
    target = jax.random.randint(k2, (B, T), 0, V, dtype=jnp.int32)
    mask = (jax.random.uniform(k3, (B, T)) > 0.3).astype(jnp.float32)
    mask = mask.at[0, 0].set(1.0)                      # ensure mask.sum() > 0

    loss = loss_with_ls(prediction, target, mask, size=V, smooth=smooth,
                        **tile_kwargs)
    loss = jax.block_until_ready(loss)
    ref = _reference(prediction, target, mask, size=V, smooth=smooth)
    np.testing.assert_allclose(np.asarray(loss), np.asarray(ref),
                               rtol=2e-4, atol=1e-5)


if __name__ == "__main__":
    key = jax.random.PRNGKey(0)
    ka, kb, kc, kd, ke = jax.random.split(key, 5)
    # Aligned case (full-chunk path, 2 row tiles).
    _run_case(ka, B=2, T=8, V=512, smooth=0.1)
    # Ragged rows + ragged vocab (in-kernel tail selects, no padding).
    _run_case(kb, B=2, T=7, V=500, smooth=0.1)
    # Multiple vocab tiles -> output-block accumulation across the reduction
    # axis and the pl.when(last-vocab-tile) tail branch.
    _run_case(kc, B=2, T=7, V=500, smooth=0.2, tile_v=128)
    # Native bf16 log-probs streamed and upcast per chunk in-kernel.
    _run_case(kd, B=2, T=8, V=512, smooth=0.1, dtype=jnp.bfloat16)
    # Multi-strip row tile (exercises the pl.loop-over-strips path).
    _run_case(ke, B=4, T=20, V=384, smooth=0.1)
    print("KERNEL_OK")
</pallas_src>

<mosaic_0001>
module attributes {stable_mosaic.version = 11 : i64} {
  func.func @_loss_ls_kernel(%arg0: i32, %arg1: i32, %arg2: memref<8x512xf32, #tpu.memory_space<vmem>>, %arg3: memref<8x1xi32, #tpu.memory_space<vmem>>, %arg4: memref<8x1xf32, #tpu.memory_space<vmem>>, %arg5: memref<8x128xf32, #tpu.memory_space<vmem>>) attributes {dimension_semantics = [#tpu.dimension_semantics<parallel>, #tpu.dimension_semantics<arbitrary>], iteration_bounds = array<i64: 2, 1>, scalar_prefetch = 0 : i64, scratch_operands = 0 : i64, tpu.core_type = #tpu.core_type<tc>, window_params = [{transform_indices = @transform_0, window_bounds = array<i64: 8, 512>}, {transform_indices = @transform_1, window_bounds = array<i64: 8, 1>}, {transform_indices = @transform_2, window_bounds = array<i64: 8, 1>}, {transform_indices = @transform_3, window_bounds = array<i64: 8, 128>}]} {
    %c0_i32 = arith.constant 0 : i32
    %0 = arith.cmpi eq, %arg1, %c0_i32 : i32
    %1 = arith.extui %0 : i1 to i32
    %c0_i32_0 = arith.constant 0 : i32
    %2 = arith.cmpi ne, %1, %c0_i32_0 : i32
    scf.if %2 {
      %cst_14 = arith.constant 0.000000e+00 : f32
      %61 = vector.broadcast %cst_14 : f32 to vector<8x128xf32>
      %c0_15 = arith.constant 0 : index
      %c0_16 = arith.constant 0 : index
      %62 = vector.load %arg5[%c0_15, %c0_16] : memref<8x128xf32, #tpu.memory_space<vmem>>, vector<8x128xf32>
      tpu.vector_store %arg5[%c0_15, %c0_16], %61 {strides = array<i32>} : memref<8x128xf32, #tpu.memory_space<vmem>>, vector<8x128xf32>,
    } else {
    }
    %c512_i32 = arith.constant 512 : i32
    %3 = arith.muli %arg1, %c512_i32 : i32
    %4 = tpu.iota {dimensions = array<i32: 1>} : vector<8x128xi32>
    %cst = arith.constant 0.899999976 : f32
    %cst_1 = arith.constant 1.95694724E-4 : f32
    %c0_i32_2 = arith.constant 0 : i32
    %c1_i32 = arith.constant 1 : i32
    %5 = arith.muli %c0_i32_2, %c1_i32 : i32
    %c0_i32_3 = arith.constant 0 : i32
    %6 = arith.addi %c0_i32_3, %5 : i32
    %c8_i32 = arith.constant 8 : i32
    %7 = arith.muli %6, %c8_i32 : i32
    %8 = tpu.assume_multiple %7, 8 : i32
    %9 = arith.index_cast %8 : i32 to index
    %c0 = arith.constant 0 : index
    %10 = vector.load %arg3[%9, %c0] : memref<8x1xi32, #tpu.memory_space<vmem>>, vector<8x1xi32>
    %11 = vector.broadcast %3 : i32 to vector<8x1xi32>
    %12 = arith.subi %10, %11 : vector<8x1xi32>
    %13 = vector.broadcast %12 : vector<8x1xi32> to vector<8x128xi32>
    %14 = arith.subi %13, %4 : vector<8x128xi32>
    %cst_4 = arith.constant 0.000000e+00 : f32
    %15 = vector.broadcast %cst_4 : f32 to vector<8x128xf32>
    %16 = arith.index_cast %8 : i32 to index
    %c0_5 = arith.constant 0 : index
    %17 = vector.load %arg2[%16, %c0_5] : memref<8x512xf32, #tpu.memory_space<vmem>>, vector<8x128xf32>
    %c0_i32_6 = arith.constant 0 : i32
    %18 = vector.broadcast %c0_i32_6 : i32 to vector<8x128xi32>
    %19 = arith.cmpi eq, %14, %18 : vector<8x128xi32>
    %20 = vector.broadcast %cst : f32 to vector<8x128xf32>
    %21 = vector.broadcast %cst_1 : f32 to vector<8x128xf32>
    %22 = arith.select %19, %20, %21 : vector<8x128xi1>, vector<8x128xf32>
    %23 = arith.mulf %22, %17 : vector<8x128xf32>
    %24 = arith.addf %15, %23 : vector<8x128xf32>
    %25 = arith.index_cast %8 : i32 to index
    %c128 = arith.constant 128 : index
    %26 = vector.load %arg2[%25, %c128] : memref<8x512xf32, #tpu.memory_space<vmem>>, vector<8x128xf32>
    %c128_i32 = arith.constant 128 : i32
    %27 = vector.broadcast %c128_i32 : i32 to vector<8x128xi32>
    %28 = arith.cmpi eq, %14, %27 : vector<8x128xi32>
    %29 = vector.broadcast %cst : f32 to vector<8x128xf32>
    %30 = vector.broadcast %cst_1 : f32 to vector<8x128xf32>
    %31 = arith.select %28, %29, %30 : vector<8x128xi1>, vector<8x128xf32>
    %32 = arith.mulf %31, %26 : vector<8x128xf32>
    %33 = arith.addf %24, %32 : vector<8x128xf32>
    %34 = arith.index_cast %8 : i32 to index
    %c256 = arith.constant 256 : index
    %35 = vector.load %arg2[%34, %c256] : memref<8x512xf32, #tpu.memory_space<vmem>>, vector<8x128xf32>
    %c256_i32 = arith.constant 256 : i32
    %36 = vector.broadcast %c256_i32 : i32 to vector<8x128xi32>
    %37 = arith.cmpi eq, %14, %36 : vector<8x128xi32>
    %38 = vector.broadcast %cst : f32 to vector<8x128xf32>
    %39 = vector.broadcast %cst_1 : f32 to vector<8x128xf32>
    %40 = arith.select %37, %38, %39 : vector<8x128xi1>, vector<8x128xf32>
    %41 = arith.mulf %40, %35 : vector<8x128xf32>
    %42 = arith.addf %33, %41 : vector<8x128xf32>
    %43 = arith.index_cast %8 : i32 to index
    %c384 = arith.constant 384 : index
    %44 = vector.load %arg2[%43, %c384] : memref<8x512xf32, #tpu.memory_space<vmem>>, vector<8x128xf32>
    %c384_i32 = arith.constant 384 : i32
    %45 = vector.broadcast %c384_i32 : i32 to vector<8x128xi32>
    %46 = arith.cmpi eq, %14, %45 : vector<8x128xi32>
    %47 = vector.broadcast %cst : f32 to vector<8x128xf32>
    %48 = vector.broadcast %cst_1 : f32 to vector<8x128xf32>
    %49 = arith.select %46, %47, %48 : vector<8x128xi1>, vector<8x128xf32>
    %50 = arith.mulf %49, %44 : vector<8x128xf32>
    %51 = arith.addf %42, %50 : vector<8x128xf32>
    %52 = arith.index_cast %8 : i32 to index
    %c0_7 = arith.constant 0 : index
    %53 = vector.load %arg4[%52, %c0_7] : memref<8x1xf32, #tpu.memory_space<vmem>>, vector<8x1xf32>
    %54 = vector.broadcast %53 : vector<8x1xf32> to vector<8x128xf32>
    %55 = arith.mulf %54, %51 : vector<8x128xf32>
    %c0_8 = arith.constant 0 : index
    %c0_9 = arith.constant 0 : index
    %56 = vector.load %arg5[%c0_8, %c0_9] : memref<8x128xf32, #tpu.memory_space<vmem>>, vector<8x128xf32>
    %57 = vector.shape_cast %55 : vector<8x128xf32> to vector<1x8x128xf32>
    %cst_10 = arith.constant dense<0.000000e+00> : vector<8x128xf32>
    %58 = vector.multi_reduction <add>, %57, %cst_10 [0] : vector<1x8x128xf32> to vector<8x128xf32>
    %59 = arith.addf %56, %58 : vector<8x128xf32>
    %c0_11 = arith.constant 0 : index
    %c0_12 = arith.constant 0 : index
    %60 = vector.load %arg5[%c0_11, %c0_12] : memref<8x128xf32, #tpu.memory_space<vmem>>, vector<8x128xf32>
    tpu.vector_store %arg5[%c0_11, %c0_12], %59 {strides = array<i32>} : memref<8x128xf32, #tpu.memory_space<vmem>>, vector<8x128xf32>,
    %c1_i32_13 = arith.constant 1 : i32
    return
  }
  func.func @transform_0(%arg0: i32, %arg1: i32) -> (i32, i32) {
    %c0_i32 = arith.constant 0 : i32
    return %arg0, %arg1 : i32, i32
  }
  func.func @transform_1(%arg0: i32, %arg1: i32) -> (i32, i32) {
    %c0_i32 = arith.constant 0 : i32
    %c0_i32_0 = arith.constant 0 : i32
    return %arg0, %c0_i32 : i32, i32
  }
  func.func @transform_2(%arg0: i32, %arg1: i32) -> (i32, i32) {
    %c0_i32 = arith.constant 0 : i32
    %c0_i32_0 = arith.constant 0 : i32
    return %arg0, %c0_i32 : i32, i32
  }
  func.func @transform_3(%arg0: i32, %arg1: i32) -> (i32, i32) {
    %c0_i32 = arith.constant 0 : i32
    %c0_i32_0 = arith.constant 0 : i32
    return %arg0, %c0_i32 : i32, i32
  }
}

</mosaic_0001>

<bundles_post_ra>
// kernel: tpu_custom_call.1
= control target key start
LH: loop header
LB: loop body
LE: loop exit
PB: predicated region body
PF: predicated region fallthrough
CT: control target
= control target key end

     0   :  { %8 = vsyncpa [#allocation3], 0  ;;  %s772_s0 = inlined_call_operand.hbm [shape: f32[16,512], index: 0, kind: input, shape index: {}]   ;;  %s773_s1 = inlined_call_operand.vmem [shape: s32[16,1], index: 1, kind: input, shape index: {}]   ;;  %s774_s2 = inlined_call_operand.vmem [shape: f32[16,1], index: 2, kind: input, shape index: {}]   ;;  %s775_s3 = inlined_call_operand.hbm [shape: f32[16,128], index: 3, kind: output, shape index: {}]  }
   0x1   :  { %10 = vsyncpa [#allocation3 + $0x1], 0 }
   0x2   :  { %11 = vsyncpa [#allocation4], 0 }
   0x3   :  { %13 = vsyncpa [#allocation4 + $0x1], 0  ;;  %s623_s12 = smov 0   ;;  %s625_s13 = smov 0  }
   0x4   :  { %s627_s14 = smov 0   ;;  %s629_s15 = smov 0  }
   0x5   :  { %s631_s16 = smov 0   ;;  %s633_s17 = smov 0  }
   0x6 LB: > { %s406_s18 = sadd.s32 4294967295, %s597_s17   ;;  %s407_s19 = sadd.s32 4294967294, %s597_s17   ;;  %s597_s17 = sphi %s633_s17, %s19_s17   ;;  %s593_s16 = sphi %s631_s16, %s787_s16   ;;  %s589_s15 = sphi %s629_s15, %s786_s15   ;;  %s585_s14 = sphi %s627_s14, %s785_s14   ;;  %s581_s13 = sphi %s625_s13, %s784_s13   ;;  %s577_s12 = sphi %s623_s12, %s783_s12  }
   0x7   : > { %s31_s20 = sadd.s32 1, %s593_s16  ;;  %s40_s21 = sadd.s32 1, %s585_s14 }
   0x8   : > { %p33_p0 = scmp.ge.s32.totalorder %s31_s20, 2  ;;  %p47_p1 = scmp.ne.s32.totalorder %s585_s14, %s581_s13 }
   0x9   : > { %p48_p2 = scmp.eq.s32.totalorder %s597_s17, 0  ;;  %p53_p3 = scmp.ne.s32.totalorder %s581_s13, %s577_s12 }
   0xa   : > { %s789_s20 = smov (%p33_p0, %s31_s20), 0  ;;  %p54_p5 = scmp.eq.s32.totalorder %s406_s18, 0 }
   0xb   : > { %p664_p4 = por %p48_p2, %p47_p1  ;;  %s35_s23 = ssub.s32 %s593_s16, %s789_s20 }
   0xc   : > { %p129_p6 = scmp.eq.s32.totalorder %s406_s18, 1  ;;  %p38_p7 = scmp.eq.s32.totalorder %s35_s23, 0 }
   0xd   : > { %p670_p8 = por %p54_p5, %p53_p3  ;;  %p135_p10 = scmp.eq.s32.totalorder %s407_s19, 1 }
   0xe   : > { %p674_p9 = por %p129_p6, %p47_p1  ;;  %p435_p13 = scmp.lt.s32.totalorder %s597_s17, 2 }
   0xf   : > { %s679_s26 = scalar_select %p38_p7, %s585_s14, %s40_s21  }
  0x10   : > { %p681_p11 = por %p135_p10, %p53_p3  ;;  %s155_s28 = sand.u32 1, %s585_s14  }
  0x11   : > { %s410_s29 = sshll.u32 %s155_s28, 5  ;;  %s422_s30 = sshll.u32 %s593_s16, 9 }
  0x12   : > { %s779_s27 = scalar_select %p681_p11, 1, 0 }
  0x13   : > { %s167_s6 = scalar_lea.hbm %s772_s0, %s422_s30  ;;  %s159_s7 = scalar_lea.vmem [#allocation2], %s410_s29 }
  0x14   : > { %s169_s8 = sshll.u32 %s159_s7, 4  ;;  %p694_p0 = pnand %p435_p13, %p664_p4  ;;  %s170_s8 = int_to_ptr.vmem [resolvable:$true] %s169_s8 }
  0x15   : > { %p413_p1 = scmp.ge.s32.totalorder %s597_s17, 1  ;;  %p188_p2 = scmp.lt.s32.totalorder %s597_s17, 3 }
  0x16   : > { %s156_s10 = scalar_lea.sflag [#allocation3], %s155_s28  ;;  %p491_p3 = pneg %p694_p0 }
  0x17   : > { %s502_s11 = scalar_lea.vmem %s170_s8, 512  ;;  %s599_s18 = smov [#allocation2]  }
  0x18   : > { %p503_p5 = scmp.ne.s32.totalorder %s170_s8, %s502_s11  ;;  %s507_s19 = sshll.u32 %s599_s18, 4  ;;  %s508_s19 = int_to_ptr.vmem [resolvable:$false] %s507_s19 }
  0x19   : > { %s509_s21 = scalar_lea.vmem %s508_s19, 1024  ;;  %p510_p10 = scmp.lt.s32.totalorder %s170_s8, %s508_s19 }
  0x1a   : > { %p505_p6 = pnand %p503_p5, %p491_p3  ;;  %p511_p12 = scmp.lt.s32.totalorder %s509_s21, %s502_s11 }
  0x1c   : > { %p506_p7 = pneg %p505_p6  ;;  %p512_p4 = por %p511_p12, %p510_p10 }
  0x1e   : > { %p513_p13 = pnand %p512_p4, %p506_p7 }
  0x20   : > { %516 = shalt.err (!%p513_p13)
}
  0x21   : > { %430 = dma.hbm_to_vmem [thread:$0]  (!%p694_p0), %s167_s6, 512, %s170_s8, %s156_s10  }
  0x22   : > { %p189_p11 = pnand %p413_p1, %p188_p2 }
  0x23   : > { %s709_s22 = sand.u32 (!%p189_p11), 1, %s581_s13  }
  0x24   : > { %192 = sbr.rel (%p189_p11) target bundleno = 200 (0xc8), region = 32  ;;  %s414_s23 = sshll.u32 (!%p189_p11), %s709_s22, 5 }
  0x25   : > { %s195_s28 = scalar_lea.sflag (!%p189_p11), [#allocation3], %s709_s22  ;;  %s713_s29 = scalar_lea.vmem (!%p189_p11), [#allocation2], %s414_s23 }
  0x29   : > { %568 = dma.done.wait (%p670_p8), %s195_s28, 512  }
  0x2a   : > { %570 = vsyncadd (%p670_p8), %s195_s28, 4294966784  ;;  %p230_p12 = scmp.lt.s32.totalorder %s589_s15, 1  ;;  %v600_v0 = vmov 0   ;;  %v244_v3 = vlaneseq  ;;  %v256_v7 = vld [vmem:[%s713_s29] sm:$0xff]  ;;  %v261_v8 = vld [vmem:[%s713_s29 + $0x8] sm:$0xff]  ;;  %s415_s24 = sshll.u32 %s709_s22, 3 }
  0x2b   : > { %488 = vset.pattern.permute.xlu0 %v600_v0  ;;  %v266_v9 = vld [vmem:[%s713_s29 + $0x10] sm:$0xff]  ;;  %v601_v10 = vmov 0.00019569472   ;;  %v271_v16 = vld [vmem:[%s713_s29 + $0x18] sm:$0xff]  ;;  %s419_s11 = sshll.u32 %s589_s15, 7  ;;  %s228_s18 = scalar_lea.vmem [#allocation5], %s415_s24 }
  0x2c   : > { %s231_s30 = scalar_select %p230_p12, %s589_s15, 1  ;;  %v245_v4 = vand.u32 127, %v244_v3 }
  0x2d   : > { %s301_s19 = sshll.u32 %s228_s18, 4  ;;  %s299_s28 = scalar_lea.hbm %s775_s3, %s419_s11  ;;  %s302_s19 = int_to_ptr.vmem [resolvable:$true] %s301_s19 }
  0x2e   : > { %s416_s4 = sshll.u32 %s231_s30, 3  ;;  %s288_s30 = scalar_lea.sflag [#allocation4], %s709_s22 }
  0x2f   : > { %s233_s7 = scalar_lea.vmem %s773_s1, %s416_s4  ;;  %s237_s10 = scalar_lea.vmem %s774_s2, %s416_s4 }
  0x30   : > { %v246_v1 = vld [vmem:[%s233_s7] sm:$0xff]  ;;  %s517_s29 = scalar_lea.vmem %s302_s19, 128  ;;  %s602_s4 = smov [#allocation5]  }
  0x31   : > { %250 = vperm.xlu0 %488, %v246_v1   ;;  %v276_v2 = vld [vmem:[%s237_s10] sm:$0xff]  ;;  %p518_p8 = scmp.ne.s32.totalorder %s302_s19, %s517_s29  ;;  %s521_s5 = sshll.u32 %s602_s4, 4  ;;  %s522_s5 = int_to_ptr.vmem [resolvable:$false] %s521_s5 }
  0x32   : > { %s523_s6 = scalar_lea.vmem %s522_s5, 256  ;;  %p524_p1 = scmp.lt.s32.totalorder %s302_s19, %s522_s5 }
  0x33   : > { %p519_p11 = pnand %p518_p8, %p674_p9  ;;  %p525_p2 = scmp.lt.s32.totalorder %s523_s6, %s517_s29 }
  0x35   : > { %279 = vperm.xlu0 %488, %v276_v2   ;;  %p520_p0 = pneg %p519_p11  ;;  %p526_p3 = por %p525_p2, %p524_p1 }
  0x37   : > { %p527_p5 = pnand %p526_p3, %p520_p0 }
  0xac   : > { %v251_v5 = vpop.permute.xlu0 %250 }
  0xad   : > { %v252_v6 = vsub.s32 %v251_v5, %v245_v4 }
  0xaf   : > { %vm257_vm0 = vcmp.eq.s32.totalorder %v252_v6, 0  ;;  %vm262_vm1 = vcmp.eq.s32.totalorder %v252_v6, 128  ;;  %vm267_vm2 = vcmp.eq.s32.totalorder %v252_v6, 256  ;;  %vm272_vm3 = vcmp.eq.s32.totalorder %v252_v6, 384 }
  0xb0   : > { %v258_v11 = vsel %vm257_vm0, 0.9, %v601_v10  ;;  %v263_v12 = vsel %vm262_vm1, 0.9, %v601_v10  ;;  %v268_v13 = vsel %vm267_vm2, 0.9, %v601_v10  ;;  %v280_v23 = vpop.permute.xlu0 %279 }
  0xb1   : > { %v259_v14 = vmul.f32 %v258_v11, %v256_v7  ;;  %v264_v15 = vmul.f32 %v263_v12, %v261_v8  ;;  %v273_v17 = vsel %vm272_vm3, 0.9, %v601_v10  ;;  %v269_v19 = vmul.f32 %v268_v13, %v266_v9 }
  0xb2   : > { %v274_v21 = vmul.f32 %v273_v17, %v271_v16 }
  0xb3   : > { %v265_v18 = vadd.f32 %v264_v15, %v259_v14 }
  0xb5   : > { %v270_v20 = vadd.f32 %v269_v19, %v265_v18 }
  0xb7   : > { %v275_v22 = vadd.f32 %v274_v21, %v270_v20 }
  0xb9   : > { %v282_v24 = vmul.f32 %v280_v23, %v275_v22 }
  0xbb   : > { %286 = vst [vmem:[%s228_s18] sm:$0xff] %v282_v24 }
  0xbc   : > { %530 = shalt.err (!%p527_p5)
}
  0xbd   : > { %s531_s15 = scalar_lea.hbm %s299_s28, 128  ;;  %s535_s8 = scalar_lea.hbm %s775_s3, 256 }
  0xbe   : > { %p532_p6 = scmp.ne.s32.totalorder %s299_s28, %s531_s15  ;;  %p536_p4 = scmp.lt.s32.totalorder %s299_s28, %s775_s3 }
  0xbf   : > { %p537_p13 = scmp.lt.s32.totalorder %s535_s8, %s531_s15 }
  0xc0   : > { %p533_p7 = pnand %p532_p6, %p674_p9 }
  0xc1   : > { %p538_p12 = por %p537_p13, %p536_p4 }
  0xc2   : > { %p534_p10 = pneg %p533_p7 }
  0xc4   : > { %p539_p8 = pnand %p538_p12, %p534_p10 }
  0xc6   : > { %542 = shalt.err (!%p539_p8)
}
  0xc7   : > { %425 = dma.vmem_to_hbm [thread:$0]  (%p674_p9), %s302_s19, 128, %s299_s28, %s288_s30  }
  0xc8 PF: > { %s313_s24 = sand.u32 1, %s577_s12   ;;  %p781_p11 = scmp.ne.s32.totalorder %s779_s27, 0 }
  0xc9   : > { %p782_p0 = scmp.ge.s32.totalorder %s597_s17, 2  ;;  %s314_s11 = scalar_lea.sflag [#allocation4], %s313_s24 }
  0xcb   : > { %p432_p1 = pnand %p782_p0, %p781_p11 }
  0xcd   : > { %p433_p2 = pneg %p432_p1 }
  0xcf   : > { %572 = dma.done.wait (%p433_p2), %s314_s11, 128  }
  0xd0   : > { %574 = vsyncadd (%p433_p2), %s314_s11, 4294967168  ;;  %s19_s17 = sadd.s32 1, %s597_s17   ;;  %s783_s12 = smov %s581_s13 }
  0xd1   : > { %p16_p3 = scmp.ge.s32.totalorder %s19_s17, 4   ;;  %s784_s13 = smov %s585_s14 }
  0xd2   : > { %s785_s14 = smov %s679_s26  ;;  %s786_s15 = smov %s593_s16 }
  0xd3   : > { %s787_s16 = smov %s789_s20  ;;  %18 = sbr.rel (!%p16_p3) target bundleno = 6 (0x6), region = 88 }
  0xd8   :  { %319 = vsyncpa [#allocation3], 1 }
  0xd9   :  { %321 = vsyncpa [#allocation3 + $0x1], 1 }
  0xda   :  { %322 = vsyncpa [#allocation4], 1 }
  0xdb   :  { %324 = vsyncpa [#allocation4 + $0x1], 1 }

</bundles_post_ra>
